<compile_context>
chip_gen: v5e
topology: v5e:2x2
jax: 0.10.0
libtpu: 0.0.40
codegen_flags: <defaults>
</compile_context>

<pallas_src>
import jax
import jax.numpy as jnp
from jax.experimental import pallas as pl
from jax.experimental.pallas import tpu as pltpu

# ----- module constants (from the PyTorch __init__) -----
FACTOR = 20
HIDDEN = [250, 200]
NOISE_SIZE = 128
SENTENCE_VECTOR_SIZE = 300
TOTAL_KEYPOINTS = 17

IN_DIM = NOISE_SIZE + SENTENCE_VECTOR_SIZE          # 428
OUT_DIM = TOTAL_KEYPOINTS * 3                        # 51
SPLIT = TOTAL_KEYPOINTS * 2                          # 34

# lane-aligned (multiple-of-128) padded feature dims for weights / outputs
D_H0 = 256
D_H1 = 256
D_OUT = 128

MAX_TM = 1024        # max batch rows per grid step (footprint ~6 MiB << VMEM)
MIN_SPLIT_B = 128    # above this, force >= 2 tiles so both v7x TCs get work


def _cdiv(a, b):
    return (a + b - 1) // b


def _round_up(x, m):
    return _cdiv(x, m) * m


def _choose_tiling(B):
    """Pick (tm, grid) with tm a multiple of 8 (or == B when B <= 8), no padding."""
    if B <= 8:
        return B, 1                                  # block == full batch dim (legal)
    min_tiles = 2 if B > MIN_SPLIT_B else 1          # megacore: keep both TCs busy
    num_tiles = max(min_tiles, _cdiv(B, MAX_TM))
    tm = _round_up(_cdiv(B, num_tiles), 8)
    grid = _cdiv(B, tm)                              # ragged last tile is OK
    return tm, grid


# --------------------------------------------------------------------------
# One-time parameter preparation (NOT in the per-call jitted path)
# --------------------------------------------------------------------------
def prepare_params(params):
    """Pad/pack params once. Weights -> bf16 (MXU), biases stay f32.

    Layer-1 weight is split into the noise part (K=128) and the sentence part
    (K=300, unpadded) so the wrapper never materializes a (B,428) concat and the
    MXU never multiplies dead K columns.
    """
    w1, b1, w2, b2, w3, b3 = [jnp.asarray(p, jnp.float32) for p in params]
    bf16, f32 = jnp.bfloat16, jnp.float32

    w1n_p = (jnp.zeros((NOISE_SIZE, D_H0), f32)
             .at[:, :HIDDEN[0]].set(w1[:NOISE_SIZE, :]).astype(bf16))
    w1s_p = (jnp.zeros((SENTENCE_VECTOR_SIZE, D_H0), f32)
             .at[:, :HIDDEN[0]].set(w1[NOISE_SIZE:, :]).astype(bf16))
    b1_p = jnp.zeros((1, D_H0), f32).at[0, :HIDDEN[0]].set(b1)

    w2_p = (jnp.zeros((D_H0, D_H1), f32)
            .at[:HIDDEN[0], :HIDDEN[1]].set(w2).astype(bf16))
    b2_p = jnp.zeros((1, D_H1), f32).at[0, :HIDDEN[1]].set(b2)

    w3_p = (jnp.zeros((D_H1, D_OUT), f32)
            .at[:HIDDEN[1], :OUT_DIM].set(w3).astype(bf16))
    b3_p = jnp.zeros((1, D_OUT), f32).at[0, :OUT_DIM].set(b3)

    return (w1n_p, w1s_p, b1_p, w2_p, b2_p, w3_p, b3_p)


# --------------------------------------------------------------------------
# Kernel: one batch tile per grid step; all weights VMEM-resident
# --------------------------------------------------------------------------
def generator_r_kernel(noise_ref, sent_ref, w1n_ref, w1s_ref, b1_ref,
                       w2_ref, b2_ref, w3_ref, b3_ref, o_ref):
    f32, bf16 = jnp.float32, jnp.bfloat16
    # Layer 1: split-K (noise part + sentence part), bf16 MXU dots, f32 accumulate.
    h1 = jnp.dot(noise_ref[...].astype(bf16), w1n_ref[...], preferred_element_type=f32)
    h1 = h1 + jnp.dot(sent_ref[...].astype(bf16), w1s_ref[...], preferred_element_type=f32)
    h1 = jnp.maximum(h1 + b1_ref[...], 0.0)
    # Layer 2
    h2 = jnp.dot(h1.astype(bf16), w2_ref[...], preferred_element_type=f32)
    h2 = jnp.maximum(h2 + b2_ref[...], 0.0)
    # Layer 3
    o = jnp.dot(h2.astype(bf16), w3_ref[...], preferred_element_type=f32) + b3_ref[...]
    # Epilogue: cols [0,34) * FACTOR (one f32 VPU mul), cols [34,:) -> sigmoid (EUP).
    col = jax.lax.broadcasted_iota(jnp.int32, o.shape, dimension=1)
    o_ref[...] = jnp.where(col < SPLIT, o * FACTOR, jax.nn.sigmoid(o))


# --------------------------------------------------------------------------
# Per-call wrapper (jitted): no activation copies, just pallas_call + col slice
# --------------------------------------------------------------------------
@jax.jit
def generator_r_forward(noise_vector, sentence_vector, prepped):
    """noise: (B,128) f32, sentence: (B,300) f32, prepped from prepare_params -> (B,51) f32."""
    w1n_p, w1s_p, b1_p, w2_p, b2_p, w3_p, b3_p = prepped
    B = noise_vector.shape[0]
    tm, grid = _choose_tiling(B)

    def batch_spec(cols):
        return pl.BlockSpec((tm, cols), lambda i: (i, 0))

    def resident(shape):
        return pl.BlockSpec(shape, lambda i: (0, 0))

    out = pl.pallas_call(
        generator_r_kernel,
        out_shape=jax.ShapeDtypeStruct((B, D_OUT), jnp.float32),
        grid=(grid,),
        in_specs=[
            batch_spec(NOISE_SIZE),                  # noise tile    (tm, 128) f32
            batch_spec(SENTENCE_VECTOR_SIZE),        # sentence tile (tm, 300) f32
            resident((NOISE_SIZE, D_H0)),            # W1 (noise rows)    bf16
            resident((SENTENCE_VECTOR_SIZE, D_H0)),  # W1 (sentence rows) bf16
            resident((1, D_H0)),                     # b1 f32
            resident((D_H0, D_H1)),                  # W2 bf16
            resident((1, D_H1)),                     # b2 f32
            resident((D_H1, D_OUT)),                 # W3 bf16
            resident((1, D_OUT)),                    # b3 f32
        ],
        out_specs=batch_spec(D_OUT),
        compiler_params=pltpu.CompilerParams(
            dimension_semantics=("parallel",),
            vmem_limit_bytes=32 * 1024 * 1024,
        ),
    )(noise_vector, sentence_vector, w1n_p, w1s_p, b1_p, w2_p, b2_p, w3_p, b3_p)

    return out[:, :OUT_DIM]


# --------------------------------------------------------------------------
# References + init
# --------------------------------------------------------------------------
def init_params(key):
    """PyTorch-like init: U(-1/sqrt(fan_in), 1/sqrt(fan_in))."""
    dims = [(IN_DIM, HIDDEN[0]), (HIDDEN[0], HIDDEN[1]), (HIDDEN[1], OUT_DIM)]
    params = []
    for (fan_in, fan_out) in dims:
        key, kw, kb = jax.random.split(key, 3)
        bound = 1.0 / jnp.sqrt(jnp.float32(fan_in))
        w = jax.random.uniform(kw, (fan_in, fan_out), jnp.float32, -bound, bound)
        b = jax.random.uniform(kb, (fan_out,), jnp.float32, -bound, bound)
        params += [w, b]
    return tuple(params)


def reference_forward_f32(noise_vector, sentence_vector, params):
    """Pure f32 semantic reference (matches the PyTorch module)."""
    w1, b1, w2, b2, w3, b3 = params
    x = jnp.concatenate([noise_vector, sentence_vector], axis=1)
    h = jnp.maximum(x @ w1 + b1, 0.0)
    h = jnp.maximum(h @ w2 + b2, 0.0)
    o = h @ w3 + b3
    return jnp.concatenate(
        [o[:, :SPLIT] * FACTOR, jax.nn.sigmoid(o[:, SPLIT:OUT_DIM])], axis=1)


def reference_forward_matched(noise_vector, sentence_vector, params):
    """Reference matching the kernel's bf16-input / f32-accumulate numerics."""
    w1, b1, w2, b2, w3, b3 = params
    f32 = jnp.float32
    bf = lambda a: a.astype(jnp.bfloat16)
    h1 = (jnp.dot(bf(noise_vector), bf(w1[:NOISE_SIZE]), preferred_element_type=f32)
          + jnp.dot(bf(sentence_vector), bf(w1[NOISE_SIZE:]), preferred_element_type=f32)
          + b1)
    h1 = jnp.maximum(h1, 0.0)
    h2 = jnp.maximum(jnp.dot(bf(h1), bf(w2), preferred_element_type=f32) + b2, 0.0)
    o = jnp.dot(bf(h2), bf(w3), preferred_element_type=f32) + b3
    return jnp.where(jnp.arange(OUT_DIM)[None, :] < SPLIT, o * FACTOR, jax.nn.sigmoid(o))


if __name__ == "__main__":
    key = jax.random.PRNGKey(0)
    k_params, k_a, k_b = jax.random.split(key, 3)

    params = init_params(k_params)
    prepped = prepare_params(params)   # padded + bf16 weights, done once

    def run_and_check(B, kk):
        kn, ks = jax.random.split(kk, 2)
        noise = jax.random.normal(kn, (B, NOISE_SIZE), jnp.float32)
        sentence = jax.random.normal(ks, (B, SENTENCE_VECTOR_SIZE), jnp.float32)
        out = jax.block_until_ready(generator_r_forward(noise, sentence, prepped))
        assert out.shape == (B, OUT_DIM), out.shape
        # Tight check vs. bf16-matched reference (same numerics as the kernel).
        ref_m = reference_forward_matched(noise, sentence, params)
        assert jnp.allclose(out, ref_m, atol=1e-2, rtol=1e-2), "mismatch vs matched ref"
        # Loose sanity check vs. pure-f32 reference (bounds bf16 quantization drift).
        ref_f = reference_forward_f32(noise, sentence, params)
        assert float(jnp.max(jnp.abs(out - ref_f))) < 0.5, "drift vs f32 reference too large"
        return out

    # Small batch: single full-batch tile (tm=4, grid=1).
    run_and_check(4, k_a)
    # Non-multiple batch exercising the 2-tile ragged path (tm=104, grid=2).
    run_and_check(200, k_b)

    print("KERNEL_OK")
</pallas_src>

<mosaic_0001>
module attributes {stable_mosaic.version = 11 : i64} {
  func.func @generator_r_kernel(%arg0: i32, %arg1: memref<4x128xf32, #tpu.memory_space<vmem>>, %arg2: memref<4x300xf32, #tpu.memory_space<vmem>>, %arg3: memref<128x256xbf16, #tpu.memory_space<vmem>>, %arg4: memref<300x256xbf16, #tpu.memory_space<vmem>>, %arg5: memref<1x256xf32, #tpu.memory_space<vmem>>, %arg6: memref<256x256xbf16, #tpu.memory_space<vmem>>, %arg7: memref<1x256xf32, #tpu.memory_space<vmem>>, %arg8: memref<256x128xbf16, #tpu.memory_space<vmem>>, %arg9: memref<1x128xf32, #tpu.memory_space<vmem>>, %arg10: memref<4x128xf32, #tpu.memory_space<vmem>>) attributes {dimension_semantics = [#tpu.dimension_semantics<parallel>], iteration_bounds = array<i64: 1>, scalar_prefetch = 0 : i64, scratch_operands = 0 : i64, tpu.core_type = #tpu.core_type<tc>, window_params = [{transform_indices = @transform_0, window_bounds = array<i64: 4, 128>}, {transform_indices = @transform_1, window_bounds = array<i64: 4, 300>}, {pipeline_mode = #tpu.pipeline_mode<synchronous>, transform_indices = @transform_2, window_bounds = array<i64: 128, 256>}, {pipeline_mode = #tpu.pipeline_mode<synchronous>, transform_indices = @transform_3, window_bounds = array<i64: 300, 256>}, {pipeline_mode = #tpu.pipeline_mode<synchronous>, transform_indices = @transform_4, window_bounds = array<i64: 1, 256>}, {pipeline_mode = #tpu.pipeline_mode<synchronous>, transform_indices = @transform_5, window_bounds = array<i64: 256, 256>}, {pipeline_mode = #tpu.pipeline_mode<synchronous>, transform_indices = @transform_6, window_bounds = array<i64: 1, 256>}, {pipeline_mode = #tpu.pipeline_mode<synchronous>, transform_indices = @transform_7, window_bounds = array<i64: 256, 128>}, {pipeline_mode = #tpu.pipeline_mode<synchronous>, transform_indices = @transform_8, window_bounds = array<i64: 1, 128>}, {transform_indices = @transform_9, window_bounds = array<i64: 4, 128>}]} {
    %c0 = arith.constant 0 : index
    %c0_0 = arith.constant 0 : index
    %0 = vector.load %arg1[%c0, %c0_0] : memref<4x128xf32, #tpu.memory_space<vmem>>, vector<4x128xf32>
    %1 = arith.truncf %0 : vector<4x128xf32> to vector<4x128xbf16>
    %c0_1 = arith.constant 0 : index
    %c0_2 = arith.constant 0 : index
    %2 = vector.load %arg3[%c0_1, %c0_2] : memref<128x256xbf16, #tpu.memory_space<vmem>>, vector<128x256xbf16>
    %cst = arith.constant dense<0.000000e+00> : vector<4x256xf32>
    %3 = tpu.matmul %1, %2, %cst {dimension_numbers = #tpu.dot_dimension_numbers<[1], [0], [0], [1], [0, 0, 1, 1], [], []>} : vector<4x128xbf16>, vector<128x256xbf16>, vector<4x256xf32> -> vector<4x256xf32>
    %c0_3 = arith.constant 0 : index
    %c0_4 = arith.constant 0 : index
    %4 = vector.load %arg2[%c0_3, %c0_4] : memref<4x300xf32, #tpu.memory_space<vmem>>, vector<4x300xf32>
    %5 = arith.truncf %4 : vector<4x300xf32> to vector<4x300xbf16>
    %c0_5 = arith.constant 0 : index
    %c0_6 = arith.constant 0 : index
    %6 = vector.load %arg4[%c0_5, %c0_6] : memref<300x256xbf16, #tpu.memory_space<vmem>>, vector<300x256xbf16>
    %cst_7 = arith.constant dense<0.000000e+00> : vector<4x256xf32>
    %7 = tpu.matmul %5, %6, %cst_7 {dimension_numbers = #tpu.dot_dimension_numbers<[1], [0], [0], [1], [0, 0, 1, 1], [], []>} : vector<4x300xbf16>, vector<300x256xbf16>, vector<4x256xf32> -> vector<4x256xf32>
    %8 = arith.addf %3, %7 : vector<4x256xf32>
    %c0_8 = arith.constant 0 : index
    %c0_9 = arith.constant 0 : index
    %9 = vector.load %arg5[%c0_8, %c0_9] : memref<1x256xf32, #tpu.memory_space<vmem>>, vector<1x256xf32>
    %10 = vector.broadcast %9 : vector<1x256xf32> to vector<4x256xf32>
    %11 = arith.addf %8, %10 : vector<4x256xf32>
    %cst_10 = arith.constant 0.000000e+00 : f32
    %12 = vector.broadcast %cst_10 : f32 to vector<4x256xf32>
    %13 = arith.maximumf %11, %12 : vector<4x256xf32>
    %14 = arith.truncf %13 : vector<4x256xf32> to vector<4x256xbf16>
    %c0_11 = arith.constant 0 : index
    %c0_12 = arith.constant 0 : index
    %15 = vector.load %arg6[%c0_11, %c0_12] : memref<256x256xbf16, #tpu.memory_space<vmem>>, vector<256x256xbf16>
    %cst_13 = arith.constant dense<0.000000e+00> : vector<4x256xf32>
    %16 = tpu.matmul %14, %15, %cst_13 {dimension_numbers = #tpu.dot_dimension_numbers<[1], [0], [0], [1], [0, 0, 1, 1], [], []>} : vector<4x256xbf16>, vector<256x256xbf16>, vector<4x256xf32> -> vector<4x256xf32>
    %c0_14 = arith.constant 0 : index
    %c0_15 = arith.constant 0 : index
    %17 = vector.load %arg7[%c0_14, %c0_15] : memref<1x256xf32, #tpu.memory_space<vmem>>, vector<1x256xf32>
    %18 = vector.broadcast %17 : vector<1x256xf32> to vector<4x256xf32>
    %19 = arith.addf %16, %18 : vector<4x256xf32>
    %cst_16 = arith.constant 0.000000e+00 : f32
    %20 = vector.broadcast %cst_16 : f32 to vector<4x256xf32>
    %21 = arith.maximumf %19, %20 : vector<4x256xf32>
    %22 = arith.truncf %21 : vector<4x256xf32> to vector<4x256xbf16>
    %c0_17 = arith.constant 0 : index
    %c0_18 = arith.constant 0 : index
    %23 = vector.load %arg8[%c0_17, %c0_18] : memref<256x128xbf16, #tpu.memory_space<vmem>>, vector<256x128xbf16>
    %cst_19 = arith.constant dense<0.000000e+00> : vector<4x128xf32>
    %24 = tpu.matmul %22, %23, %cst_19 {dimension_numbers = #tpu.dot_dimension_numbers<[1], [0], [0], [1], [0, 0, 1, 1], [], []>} : vector<4x256xbf16>, vector<256x128xbf16>, vector<4x128xf32> -> vector<4x128xf32>
    %c0_20 = arith.constant 0 : index
    %c0_21 = arith.constant 0 : index
    %25 = vector.load %arg9[%c0_20, %c0_21] : memref<1x128xf32, #tpu.memory_space<vmem>>, vector<1x128xf32>
    %26 = vector.broadcast %25 : vector<1x128xf32> to vector<4x128xf32>
    %27 = arith.addf %24, %26 : vector<4x128xf32>
    %28 = tpu.iota {dimensions = array<i32: 1>} : vector<4x128xi32>
    %c34_i32 = arith.constant 34 : i32
    %29 = vector.broadcast %c34_i32 : i32 to vector<4x128xi32>
    %30 = arith.cmpi slt, %28, %29 : vector<4x128xi32>
    %cst_22 = arith.constant 2.000000e+01 : f32
    %31 = vector.broadcast %cst_22 : f32 to vector<4x128xf32>
    %32 = arith.mulf %27, %31 : vector<4x128xf32>
    %33 = arith.negf %27 : vector<4x128xf32>
    %34 = math.exp %33 : vector<4x128xf32>
    %cst_23 = arith.constant 1.000000e+00 : f32
    %35 = vector.broadcast %cst_23 : f32 to vector<4x128xf32>
    %36 = arith.addf %35, %34 : vector<4x128xf32>
    %37 = arith.divf %35, %36 : vector<4x128xf32>
    %38 = arith.select %30, %32, %37 : vector<4x128xi1>, vector<4x128xf32>
    %c0_24 = arith.constant 0 : index
    %c0_25 = arith.constant 0 : index
    %39 = vector.load %arg10[%c0_24, %c0_25] : memref<4x128xf32, #tpu.memory_space<vmem>>, vector<4x128xf32>
    tpu.vector_store %arg10[%c0_24, %c0_25], %38 {strides = array<i32>} : memref<4x128xf32, #tpu.memory_space<vmem>>, vector<4x128xf32>,
    return
  }
  func.func @transform_0(%arg0: i32) -> (i32, i32) {
    %c0_i32 = arith.constant 0 : i32
    %c0_i32_0 = arith.constant 0 : i32
    return %arg0, %c0_i32 : i32, i32
  }
  func.func @transform_1(%arg0: i32) -> (i32, i32) {
    %c0_i32 = arith.constant 0 : i32
    %c0_i32_0 = arith.constant 0 : i32
    return %arg0, %c0_i32 : i32, i32
  }
  func.func @transform_2(%arg0: i32) -> (i32, i32) {
    %c0_i32 = arith.constant 0 : i32
    %c0_i32_0 = arith.constant 0 : i32
    %c0_i32_1 = arith.constant 0 : i32
    return %c0_i32, %c0_i32_0 : i32, i32
  }
  func.func @transform_3(%arg0: i32) -> (i32, i32) {
    %c0_i32 = arith.constant 0 : i32
    %c0_i32_0 = arith.constant 0 : i32
    %c0_i32_1 = arith.constant 0 : i32
    return %c0_i32, %c0_i32_0 : i32, i32
  }
  func.func @transform_4(%arg0: i32) -> (i32, i32) {
    %c0_i32 = arith.constant 0 : i32
    %c0_i32_0 = arith.constant 0 : i32
    %c0_i32_1 = arith.constant 0 : i32
    return %c0_i32, %c0_i32_0 : i32, i32
  }
  func.func @transform_5(%arg0: i32) -> (i32, i32) {
    %c0_i32 = arith.constant 0 : i32
    %c0_i32_0 = arith.constant 0 : i32
    %c0_i32_1 = arith.constant 0 : i32
    return %c0_i32, %c0_i32_0 : i32, i32
  }
  func.func @transform_6(%arg0: i32) -> (i32, i32) {
    %c0_i32 = arith.constant 0 : i32
    %c0_i32_0 = arith.constant 0 : i32
    %c0_i32_1 = arith.constant 0 : i32
    return %c0_i32, %c0_i32_0 : i32, i32
  }
  func.func @transform_7(%arg0: i32) -> (i32, i32) {
    %c0_i32 = arith.constant 0 : i32
    %c0_i32_0 = arith.constant 0 : i32
    %c0_i32_1 = arith.constant 0 : i32
    return %c0_i32, %c0_i32_0 : i32, i32
  }
  func.func @transform_8(%arg0: i32) -> (i32, i32) {
    %c0_i32 = arith.constant 0 : i32
    %c0_i32_0 = arith.constant 0 : i32
    %c0_i32_1 = arith.constant 0 : i32
    return %c0_i32, %c0_i32_0 : i32, i32
  }
  func.func @transform_9(%arg0: i32) -> (i32, i32) {
    %c0_i32 = arith.constant 0 : i32
    %c0_i32_0 = arith.constant 0 : i32
    return %arg0, %c0_i32 : i32, i32
  }
}

</mosaic_0001>

<bundles_post_ra>
// kernel: generator_r_forward.1
= control target key start
LH: loop header
LB: loop body
LE: loop exit
PB: predicated region body
PF: predicated region fallthrough
CT: control target
= control target key end

     0   :  { %14 = vsyncpa [#allocation3], 0  ;;  %s1854_s0 = inlined_call_operand.hbm [shape: f32[4,128], index: 0, kind: input, shape index: {}]   ;;  %s1855_s1 = inlined_call_operand.hbm [shape: f32[4,300], index: 1, kind: input, shape index: {}]   ;;  %s1856_s2 = inlined_call_operand.hbm [shape: bf16[128,256], index: 2, kind: input, shape index: {}]   ;;  %s1857_s3 = inlined_call_operand.hbm [shape: bf16[300,256], index: 3, kind: input, shape index: {}]   ;;  %s1858_s4 = inlined_call_operand.vmem [shape: f32[1,256], index: 4, kind: input, shape index: {}]   ;;  %s1859_s5 = inlined_call_operand.hbm [shape: bf16[256,256], index: 5, kind: input, shape index: {}]   ;;  %s1860_s6 = inlined_call_operand.vmem [shape: f32[1,256], index: 6, kind: input, shape index: {}]   ;;  %s1861_s7 = inlined_call_operand.hbm [shape: bf16[256,128], index: 7, kind: input, shape index: {}]   ;;  %s1862_s8 = inlined_call_operand.vmem [shape: f32[1,128], index: 8, kind: input, shape index: {}]   ;;  %s1863_s9 = inlined_call_operand.hbm [shape: f32[4,128], index: 9, kind: output, shape index: {}]  }
   0x1   :  { %15 = vsyncpa [#allocation6], 0 }
   0x2   :  { %16 = vsyncpa [#allocation9], 0 }
   0x3   :  { %17 = vsyncpa [#allocation12], 0  ;;  %s35_s11 = sshll.u32 %s1855_s1, 4  ;;  %s36_s11 = int_to_ptr.hbm [resolvable:$true] %s35_s11 }
   0x4   :  { %18 = vsyncpa [#allocation4], 0  ;;  %s1755_s12 = smov [#allocation5]   ;;  %s58_s16 = sshll.u32 %s1857_s3, 4  ;;  %s59_s16 = int_to_ptr.hbm [resolvable:$true] %s58_s16 }
   0x5   :  { %s37_s13 = sshll.u32 %s1755_s12, 4  ;;  %s1756_s17 = smov [#allocation8]   ;;  %s38_s13 = int_to_ptr.vmem [resolvable:$true] %s37_s13 }
   0x6   :  { %40 = dma.hbm_to_vmem [thread:$0]  %s36_s11, 192, %s38_s13, [#allocation6]  }
   0x7   :  { %s60_s18 = sshll.u32 %s1756_s17, 4  ;;  %s24_s21 = sshll.u32 %s1854_s0, 4  ;;  %s61_s18 = int_to_ptr.vmem [resolvable:$true] %s60_s18  ;;  %s25_s21 = int_to_ptr.hbm [resolvable:$true] %s24_s21 }
   0x8   :  { %s1757_s1 = smov 128   ;;  %s1758_s22 = smov 8  }
   0x9   :  { %66 = dma.hbm_to_vmem [thread:$0]  %s59_s16, 4864, %s61_s18, [#allocation9], %s1757_s1, %s1757_s1, %s1758_s22  }
   0xa   :  { %s45_s25 = sshll.u32 %s1856_s2, 4  ;;  %s1759_s26 = smov [#allocation2]   ;;  %s46_s25 = int_to_ptr.hbm [resolvable:$true] %s45_s25 }
   0xb   :  { %s26_s27 = sshll.u32 %s1759_s26, 4  ;;  %s1760_s3 = smov [#allocation7]   ;;  %s27_s27 = int_to_ptr.vmem [resolvable:$true] %s26_s27 }
   0xc   :  { %29 = dma.hbm_to_vmem [thread:$0]  %s25_s21, 64, %s27_s27, [#allocation3]  }
   0xd   :  { %s47_s28 = sshll.u32 %s1760_s3, 4  ;;  %s73_s0 = sshll.u32 %s1859_s5, 4  ;;  %s48_s28 = int_to_ptr.vmem [resolvable:$true] %s47_s28  ;;  %s74_s0 = int_to_ptr.hbm [resolvable:$true] %s73_s0 }
   0xe   :  { %53 = dma.hbm_to_vmem [thread:$0]  %s46_s25, 2048, %s48_s28, [#allocation6], %s1757_s1, %s1757_s1, %s1758_s22  }
   0xf   :  { %s88_s12 = sshll.u32 %s1861_s7, 4  ;;  %s1761_s13 = smov [#allocation10]   ;;  %s89_s12 = int_to_ptr.hbm [resolvable:$true] %s88_s12 }
  0x10   :  { %s75_s2 = sshll.u32 %s1761_s13, 4  ;;  %s1762_s14 = smov [#allocation11]   ;;  %s76_s2 = int_to_ptr.vmem [resolvable:$true] %s75_s2 }
  0x11   :  { %81 = dma.hbm_to_vmem [thread:$0]  %s74_s0, 4096, %s76_s2, [#allocation9], %s1757_s1, %s1757_s1, %s1758_s22  }
  0x12   :  { %s90_s15 = sshll.u32 %s1762_s14, 4  ;;  %s1763_s16 = smov 64   ;;  %s91_s15 = int_to_ptr.vmem [resolvable:$true] %s90_s15 }
  0x13   :  { %s1764_s17 = smov 4  }
  0x14   :  { %96 = dma.hbm_to_vmem [thread:$0]  %s89_s12, 2048, %s91_s15, [#allocation12], %s1763_s16, %s1763_s16, %s1764_s17  }
  0x15   :  { %1745 = dma.done.wait [#allocation3], 64  }
  0x16   :  { %1746 = vsyncadd [#allocation3], 4294967232 }
  0x17   :  { %1747 = dma.done.wait [#allocation6], 2240  }
  0x18   :  { %1748 = vsyncadd [#allocation6], 4294965056 }
  0x19   :  { %1749 = dma.done.wait [#allocation9], 8960  }
  0x1a   :  { %1750 = vsyncadd [#allocation9], 4294958336 }
  0x1b   :  { %1751 = dma.done.wait [#allocation12], 2048  }
  0x1c   :  { %1752 = vsyncadd [#allocation12], 4294965248  ;;  %vm388_vm0 = vcmask 1045504   ;;  %v1170_v0 = vld [vmem:[#allocation8 + $0xf0] sm:$0xf]  ;;  %vm384_vm1 = vcmask 359424  }
  0x1d   :  { %v1506_v1 = vld [vmem:[#allocation8 + $0xf4] sm:$0xf0]  ;;  %v1489_v2 = vld [vmem:[#allocation8 + $0x74] sm:$0xf]  ;;  %v1108_v4 = vld [vmem:[#allocation8 + $0x78] sm:$0xf0] }
  0x1e   :  { %v1171_v3 = vor.u32 %v1506_v1, %v1170_v0  ;;  %v1162_v5 = vld [vmem:[#allocation8 + $0xe0] sm:$0xf]  ;;  %v1504_v6 = vld [vmem:[#allocation8 + $0xe4] sm:$0xf0]  ;;  %v1111_v7 = vor.u32 %v1489_v2, %v1108_v4  ;;  %v1487_v8 = vld [vmem:[#allocation8 + $0x64] sm:$0xf] }
  0x1f   :  { %v1100_v9 = vld [vmem:[#allocation8 + $0x68] sm:$0xf0]  ;;  %v1194_v10 = vld [vmem:[#allocation8 + $0x120] sm:$0xf]  ;;  %v1163_v11 = vor.u32 %v1504_v6, %v1162_v5  ;;  %v1512_v12 = vld [vmem:[#allocation8 + $0x124] sm:$0x30] }
  0x20   :  { %408 = vmatpush.bf16.msra.mxu1 %v1171_v3  ;;  %v1106_v13 = vld [vmem:[#allocation8 + $0x70] sm:$0xf]  ;;  %v1490_v14 = vld [vmem:[#allocation8 + $0x74] sm:$0xf0]  ;;  %434 = vmatpush.bf16.msra.mxu3 %v1111_v7  ;;  %v1103_v15 = vor.u32 %v1487_v8, %v1100_v9  ;;  %v1195_v16 = vor.u32 %v1512_v12, %v1194_v10  ;;  %v1485_v20 = vld [vmem:[#allocation8 + $0x54] sm:$0xf] }
  0x21   :  { %v1107_v17 = vor.u32 %v1490_v14, %v1106_v13  ;;  %v1154_v18 = vld [vmem:[#allocation8 + $0xd0] sm:$0xf]  ;;  %v1502_v19 = vld [vmem:[#allocation8 + $0xd4] sm:$0xf0]  ;;  %v1092_v21 = vld [vmem:[#allocation8 + $0x58] sm:$0xf0] }
  0x22   :  { %v1186_v22 = vld [vmem:[#allocation8 + $0x110] sm:$0xf]  ;;  %v1510_v23 = vld [vmem:[#allocation8 + $0x114] sm:$0xf0]  ;;  %v390_v24 = vsel %vm388_vm0, %v1195_v16, 0  ;;  %v1155_v27 = vor.u32 %v1502_v19, %v1154_v18  ;;  %v1095_v33 = vor.u32 %v1485_v20, %v1092_v21  ;;  %s1035_s22 = sshll.u32 %s1863_s9, 4  ;;  %s1036_s22 = int_to_ptr.hbm [resolvable:$true] %s1035_s22 }
  0x23   :  { %395 = vmatpush.bf16.msra.mxu0 %v1107_v17  ;;  %v1098_v25 = vld [vmem:[#allocation8 + $0x60] sm:$0xf]  ;;  %v1488_v26 = vld [vmem:[#allocation8 + $0x64] sm:$0xf0]  ;;  %426 = vmatpush.bf16.msra.mxu2 %v390_v24  ;;  %v1187_v28 = vor.u32 %v1510_v23, %v1186_v22  ;;  %v1483_v32 = vld [vmem:[#allocation8 + $0x44] sm:$0xf] }
  0x24   :  { %409 = vmatpush.bf16.msra.mxu1 %v1163_v11  ;;  %v1099_v29 = vor.u32 %v1488_v26, %v1098_v25  ;;  %v1146_v30 = vld [vmem:[#allocation8 + $0xc0] sm:$0xf]  ;;  %v1500_v31 = vld [vmem:[#allocation8 + $0xc4] sm:$0xf0]  ;;  %435 = vmatpush.bf16.msra.mxu3 %v1103_v15  ;;  %v1084_v34 = vld [vmem:[#allocation8 + $0x48] sm:$0xf0] }
  0x25   :  { %v1178_v35 = vld [vmem:[#allocation8 + $0x100] sm:$0xf]  ;;  %v1508_v36 = vld [vmem:[#allocation8 + $0x104] sm:$0xf0]  ;;  %v1090_v37 = vld [vmem:[#allocation8 + $0x50] sm:$0xf]  ;;  %v1147_v42 = vor.u32 %v1500_v31, %v1146_v30  ;;  %v1087_v46 = vor.u32 %v1483_v32, %v1084_v34 }
  0x26   :  { %v1486_v38 = vld [vmem:[#allocation8 + $0x54] sm:$0xf0]  ;;  %v1505_v39 = vld [vmem:[#allocation8 + $0xf4] sm:$0xf]  ;;  %v1172_v41 = vld [vmem:[#allocation8 + $0xf8] sm:$0xf0]  ;;  %v1179_v43 = vor.u32 %v1508_v36, %v1178_v35 }
  0x27   :  { %396 = vmatpush.bf16.msra.mxu0 %v1099_v29  ;;  %v1091_v40 = vor.u32 %v1486_v38, %v1090_v37  ;;  %427 = vmatpush.bf16.msra.mxu2 %v1187_v28  ;;  %v1138_v44 = vld [vmem:[#allocation8 + $0xb0] sm:$0xf]  ;;  %v1082_v45 = vld [vmem:[#allocation8 + $0x40] sm:$0xf]  ;;  %v1175_v47 = vor.u32 %v1505_v39, %v1172_v41  ;;  %v1498_v48 = vld [vmem:[#allocation8 + $0xb4] sm:$0xf0] }
  0x28   :  { %410 = vmatpush.bf16.msra.mxu1 %v1155_v27  ;;  %436 = vmatpush.bf16.msra.mxu3 %v1095_v33  ;;  %v1481_v49 = vld [vmem:[#allocation8 + $0x34] sm:$0xf]  ;;  %v1484_v50 = vld [vmem:[#allocation8 + $0x44] sm:$0xf0]  ;;  %v1076_v51 = vld [vmem:[#allocation8 + $0x38] sm:$0xf0]  ;;  %v1139_v55 = vor.u32 %v1498_v48, %v1138_v44 }
  0x29   :  { %v1503_v52 = vld [vmem:[#allocation8 + $0xe4] sm:$0xf]  ;;  %v1164_v53 = vld [vmem:[#allocation8 + $0xe8] sm:$0xf0]  ;;  %v1083_v54 = vor.u32 %v1484_v50, %v1082_v45  ;;  %v1074_v56 = vld [vmem:[#allocation8 + $0x30] sm:$0xf]  ;;  %v1079_v58 = vor.u32 %v1481_v49, %v1076_v51 }
  0x2a   :  { %v1482_v57 = vld [vmem:[#allocation8 + $0x34] sm:$0xf0]  ;;  %v1167_v59 = vor.u32 %v1503_v52, %v1164_v53  ;;  %v1130_v60 = vld [vmem:[#allocation8 + $0xa0] sm:$0xf]  ;;  %v1496_v61 = vld [vmem:[#allocation8 + $0xa4] sm:$0xf0] }
  0x2b   :  { %397 = vmatpush.bf16.msra.mxu0 %v1091_v40  ;;  %428 = vmatpush.bf16.msra.mxu2 %v1179_v43  ;;  %v1479_v62 = vld [vmem:[#allocation8 + $0x24] sm:$0xf]  ;;  %v1068_v63 = vld [vmem:[#allocation8 + $0x28] sm:$0xf0]  ;;  %v1501_v0 = vld [vmem:[#allocation8 + $0xd4] sm:$0xf]  ;;  %v1075_v2 = vor.u32 %v1482_v57, %v1074_v56  ;;  %v1131_v3 = vor.u32 %v1496_v61, %v1130_v60 }
  0x2c   :  { %411 = vmatpush.bf16.msra.mxu1 %v1147_v42  ;;  %437 = vmatpush.bf16.msra.mxu3 %v1087_v46  ;;  %v1156_v1 = vld [vmem:[#allocation8 + $0xd8] sm:$0xf0]  ;;  %v1122_v4 = vld [vmem:[#allocation8 + $0x90] sm:$0xf]  ;;  %v1066_v5 = vld [vmem:[#allocation8 + $0x20] sm:$0xf]  ;;  %v1071_v7 = vor.u32 %v1479_v62, %v1068_v63 }
  0x2d   :  { %v1480_v6 = vld [vmem:[#allocation8 + $0x24] sm:$0xf0]  ;;  %v1159_v8 = vor.u32 %v1501_v0, %v1156_v1  ;;  %v1494_v9 = vld [vmem:[#allocation8 + $0x94] sm:$0xf0]  ;;  %v1477_v10 = vld [vmem:[#allocation8 + $0x14] sm:$0xf] }
  0x2e   :  { %v1060_v11 = vld [vmem:[#allocation8 + $0x18] sm:$0xf0]  ;;  %v1499_v12 = vld [vmem:[#allocation8 + $0xc4] sm:$0xf]  ;;  %v1148_v13 = vld [vmem:[#allocation8 + $0xc8] sm:$0xf0]  ;;  %v1067_v15 = vor.u32 %v1480_v6, %v1066_v5  ;;  %v1123_v17 = vor.u32 %v1494_v9, %v1122_v4 }
  0x2f   :  { %447 = vmatpush.bf16.msrb.mxu2 %v1175_v47  ;;  %398 = vmatpush.bf16.msra.mxu0 %v1083_v54  ;;  %v143_v14 = vld [vmem:[#allocation5 + $0x8] sm:$0xf]  ;;  %v1114_v16 = vld [vmem:[#allocation8 + $0x80] sm:$0xf]  ;;  %v1492_v18 = vld [vmem:[#allocation8 + $0x84] sm:$0xf0]  ;;  %v1063_v21 = vor.u32 %v1477_v10, %v1060_v11  ;;  %v1151_v22 = vor.u32 %v1499_v12, %v1148_v13 }
  0x30   :  { %412 = vmatpush.bf16.msra.mxu1 %v1139_v55  ;;  %438 = vmatpush.bf16.msra.mxu3 %v1079_v58  ;;  %148 = vst [vmem:[#allocation1 + $0x10] ss:$2 sm:$0xff] %v143_v14  ;;  %v1058_v19 = vld [vmem:[#allocation8 + $0x10] sm:$0xf]  ;;  %v1478_v20 = vld [vmem:[#allocation8 + $0x14] sm:$0xf0]  ;;  %v1115_v32 = vor.u32 %v1492_v18, %v1114_v16 }
  0x31   :  { %v1475_v23 = vld [vmem:[#allocation8 + $0x4] sm:$0xf]  ;;  %v1052_v24 = vld [vmem:[#allocation8 + $0x8] sm:$0xf0]  ;;  %v1260_v25 = vld [vmem:[#allocation7 + $0x70] sm:$0xf]  ;;  %v1059_v30 = vor.u32 %v1478_v20, %v1058_v19 }
  0x32   :  { %v1474_v26 = vld [vmem:[#allocation7 + $0x74] sm:$0xf0]  ;;  %v1473_v27 = vld [vmem:[#allocation7 + $0x74] sm:$0xf]  ;;  %v1262_v29 = vld [vmem:[#allocation7 + $0x78] sm:$0xf0]  ;;  %v1055_v36 = vor.u32 %v1475_v23, %v1052_v24 }
  0x33   :  { %448 = vmatpush.bf16.msrb.mxu2 %v1167_v59  ;;  %399 = vmatpush.bf16.msra.mxu0 %v1075_v2  ;;  %v142_v28 = vld [vmem:[#allocation5] sm:$0xff]  ;;  %v1140_v33 = vld [vmem:[#allocation8 + $0xb8] sm:$0xf0]  ;;  %v1050_v34 = vld [vmem:[#allocation8] sm:$0xf]  ;;  %v1261_v37 = vor.u32 %v1474_v26, %v1260_v25  ;;  %v1265_v40 = vor.u32 %v1473_v27, %v1262_v29 }
  0x34   :  { %413 = vmatpush.bf16.msra.mxu1 %v1131_v3  ;;  %439 = vmatpush.bf16.msra.mxu3 %v1071_v7  ;;  %v1497_v31 = vld [vmem:[#allocation8 + $0xb4] sm:$0xf]  ;;  %146 = vst [vmem:[#allocation1] ss:$2 sm:$0xff] %v142_v28  ;;  %v1476_v35 = vld [vmem:[#allocation8 + $0x4] sm:$0xf0] }
  0x35   :  { %v1252_v38 = vld [vmem:[#allocation7 + $0x60] sm:$0xf]  ;;  %v1472_v39 = vld [vmem:[#allocation7 + $0x64] sm:$0xf0]  ;;  %v1471_v42 = vld [vmem:[#allocation7 + $0x64] sm:$0xf]  ;;  %v1143_v44 = vor.u32 %v1497_v31, %v1140_v33  ;;  %v1051_v46 = vor.u32 %v1476_v35, %v1050_v34 }
  0x36   :  { %v1254_v45 = vld [vmem:[#allocation7 + $0x68] sm:$0xf0]  ;;  %v1495_v47 = vld [vmem:[#allocation8 + $0xa4] sm:$0xf]  ;;  %v1244_v49 = vld [vmem:[#allocation7 + $0x50] sm:$0xf]  ;;  %v1253_v52 = vor.u32 %v1472_v39, %v1252_v38 }
  0x37   :  { %449 = vmatpush.bf16.msrb.mxu2 %v1159_v8  ;;  %400 = vmatpush.bf16.msra.mxu0 %v1067_v15  ;;  %v151_v41 = vld.sshfl [vmem:[#allocation1 + $0x10] sm:$0xff pattern:$0x75316420]  ;;  %v1132_v48 = vld [vmem:[#allocation8 + $0xa8] sm:$0xf0]  ;;  %v1257_v57 = vor.u32 %v1471_v42, %v1254_v45 }
  0x38   :  { %414 = vmatpush.bf16.msra.mxu1 %v1123_v17  ;;  %440 = vmatpush.bf16.msra.mxu3 %v1063_v21  ;;  %v1835_v43 = vpack.c.bf16 %v151_v41, %v151_v41  ;;  %v1511_v50 = vld [vmem:[#allocation8 + $0x124] sm:$0xf]  ;;  %v1196_v51 = vld [vmem:[#allocation8 + $0x128] sm:$0x30]  ;;  %v1470_v53 = vld [vmem:[#allocation7 + $0x54] sm:$0xf0]  ;;  %v1135_v60 = vor.u32 %v1495_v47, %v1132_v48 }
  0x39   :  { %v1469_v54 = vld [vmem:[#allocation7 + $0x54] sm:$0xf]  ;;  %v1246_v55 = vld [vmem:[#allocation7 + $0x58] sm:$0xf0]  ;;  %v1199_v56 = vor.u32 %v1511_v50, %v1196_v51  ;;  %v1245_v5 = vor.u32 %v1470_v53, %v1244_v49  ;;  %v1507_v6 = vld [vmem:[#allocation8 + $0x104] sm:$0xf] }
  0x3a   :  { %1200 = vmatmul.msk.bf16.vlgmr.msra.gmra.mxu2 %vm384_vm1, %v1835_v43  ;;  %v1509_v0 = vld [vmem:[#allocation8 + $0x114] sm:$0xf]  ;;  %v1188_v1 = vld [vmem:[#allocation8 + $0x118] sm:$0xf0]  ;;  %v1180_v7 = vld [vmem:[#allocation8 + $0x108] sm:$0xf0]  ;;  %v1249_v8 = vor.u32 %v1469_v54, %v1246_v55 }
  0x3b   :  { %450 = vmatpush.bf16.msrb.mxu2 %v1151_v22  ;;  %401 = vmatpush.bf16.msra.mxu0 %v1059_v30  ;;  %v150_v58 = vld.sshfl [vmem:[#allocation1 + $0x8] sm:$0xff pattern:$0x75316420]  ;;  %v149_v59 = vld.sshfl [vmem:[#allocation1] sm:$0xff pattern:$0x75316420]  ;;  %v1191_v4 = vor.u32 %v1509_v0, %v1188_v1  ;;  %v1183_v16 = vor.u32 %v1507_v6, %v1180_v7 }
  0x3c   :  { %415 = vmatpush.bf16.msra.mxu1 %v1115_v32  ;;  %441 = vmatpush.bf16.msra.mxu3 %v1055_v36  ;;  %v156_v61 = vpack.c.bf16 %v150_v58, %v150_v58  ;;  %v155_v62 = vpack.c.bf16 %v149_v59, %v149_v59  ;;  %v393_v63 = vsel %vm388_vm0, %v1199_v56, 0  ;;  %v1493_v2 = vld [vmem:[#allocation8 + $0x94] sm:$0xf]  ;;  %v1124_v3 = vld [vmem:[#allocation8 + $0x98] sm:$0xf0] }
  0x3d   :  { %v1236_v9 = vld [vmem:[#allocation7 + $0x40] sm:$0xf]  ;;  %v1468_v10 = vld [vmem:[#allocation7 + $0x44] sm:$0xf0]  ;;  %v1127_v11 = vor.u32 %v1493_v2, %v1124_v3  ;;  %v1467_v12 = vld [vmem:[#allocation7 + $0x44] sm:$0xf] }
  0x3e   :  { %v1238_v13 = vld [vmem:[#allocation7 + $0x48] sm:$0xf0]  ;;  %v1491_v14 = vld [vmem:[#allocation8 + $0x84] sm:$0xf]  ;;  %v1237_v17 = vor.u32 %v1468_v10, %v1236_v9  ;;  %v1228_v19 = vld [vmem:[#allocation7 + $0x30] sm:$0xf] }
  0x3f   :  { %451 = vmatpush.bf16.msrb.mxu2 %v1143_v44  ;;  %402 = vmatpush.bf16.msra.mxu0 %v1051_v46  ;;  %v1116_v15 = vld [vmem:[#allocation8 + $0x88] sm:$0xf0]  ;;  %v1241_v18 = vor.u32 %v1467_v12, %v1238_v13  ;;  %v1466_v20 = vld [vmem:[#allocation7 + $0x34] sm:$0xf0]  ;;  %v1465_v22 = vld [vmem:[#allocation7 + $0x34] sm:$0xf] }
  0x40   :  { %553 = vmatpush.bf16.msrb.mxu1 %v1261_v37  ;;  %566 = vmatpush.bf16.msrb.mxu3 %v1265_v40  ;;  %v1119_v21 = vor.u32 %v1491_v14, %v1116_v15  ;;  %v1230_v23 = vld [vmem:[#allocation7 + $0x38] sm:$0xf0]  ;;  %v1229_v24 = vor.u32 %v1466_v20, %v1228_v19  ;;  %v1220_v26 = vld [vmem:[#allocation7 + $0x20] sm:$0xf]  ;;  %v1464_v27 = vld [vmem:[#allocation7 + $0x24] sm:$0xf0] }
  0x41   :  { %442 = vmatmul.bf16.vlgmr.msra.gmra.mxu3 %v155_v62  ;;  %416 = vmatmul.bf16.vlgmr.msra.gmra.mxu1 %v156_v61  ;;  %v1233_v25 = vor.u32 %v1465_v22, %v1230_v23  ;;  %v1463_v28 = vld [vmem:[#allocation7 + $0x24] sm:$0xf]  ;;  %v1222_v29 = vld [vmem:[#allocation7 + $0x28] sm:$0xf0]  ;;  %v1221_v30 = vor.u32 %v1464_v27, %v1220_v26  ;;  %v1212_v32 = vld [vmem:[#allocation7 + $0x10] sm:$0xf] }
  0x42   :  { %403 = vmatmul.bf16.vlgmr.msra.gmra.mxu0 %v155_v62  ;;  %v1225_v31 = vor.u32 %v1463_v28, %v1222_v29  ;;  %v1462_v33 = vld [vmem:[#allocation7 + $0x14] sm:$0xf0]  ;;  %v1461_v34 = vld [vmem:[#allocation7 + $0x14] sm:$0xf]  ;;  %v1214_v35 = vld [vmem:[#allocation7 + $0x18] sm:$0xf0] }
  0x43   :  { %465 = vmatpush.bf16.msrb.mxu0 %v393_v63  ;;  %452 = vmatpush.bf16.msrb.mxu2 %v1135_v60  ;;  %v1213_v36 = vor.u32 %v1462_v33, %v1212_v32  ;;  %v1217_v37 = vor.u32 %v1461_v34, %v1214_v35  ;;  %v1204_v38 = vld [vmem:[#allocation7] sm:$0xf]  ;;  %v1460_v39 = vld [vmem:[#allocation7 + $0x4] sm:$0xf0]  ;;  %v1459_v40 = vld [vmem:[#allocation7 + $0x4] sm:$0xf] }
  0x44   :  { %554 = vmatpush.bf16.msrb.mxu1 %v1253_v52  ;;  %567 = vmatpush.bf16.msrb.mxu3 %v1257_v57  ;;  %v1206_v41 = vld [vmem:[#allocation7 + $0x8] sm:$0xf0]  ;;  %v1205_v42 = vor.u32 %v1460_v39, %v1204_v38  ;;  %v124_v44 = vld [vmem:[#allocation2] sm:$0xf]  ;;  %v1324_v47 = vld [vmem:[#allocation10 + $0x70] sm:$0xf] }
  0x45   :  { %v1209_v45 = vor.u32 %v1459_v40, %v1206_v41  ;;  %v125_v46 = vpack.c.bf16 %v124_v44, %v124_v44  ;;  %v1528_v48 = vld [vmem:[#allocation10 + $0x74] sm:$0xf0]  ;;  %v1527_v49 = vld [vmem:[#allocation10 + $0x74] sm:$0xf]  ;;  %v1326_v51 = vld [vmem:[#allocation10 + $0x78] sm:$0xf0] }
  0x46   :  { %v1325_v50 = vor.u32 %v1528_v48, %v1324_v47  ;;  %v1316_v52 = vld [vmem:[#allocation10 + $0x60] sm:$0xf]  ;;  %v1526_v53 = vld [vmem:[#allocation10 + $0x64] sm:$0xf0]  ;;  %v1525_v54 = vld [vmem:[#allocation10 + $0x64] sm:$0xf] }
  0x47   :  { %466 = vmatpush.bf16.msrb.mxu0 %v1191_v4  ;;  %453 = vmatpush.bf16.msrb.mxu2 %v1127_v11  ;;  %v1318_v55 = vld [vmem:[#allocation10 + $0x68] sm:$0xf0]  ;;  %v1317_v56 = vor.u32 %v1526_v53, %v1316_v52  ;;  %v1388_v58 = vld [vmem:[#allocation10 + $0xf0] sm:$0xf]  ;;  %v1544_v59 = vld [vmem:[#allocation10 + $0xf4] sm:$0xf0] }
  0x48   :  { %555 = vmatpush.bf16.msrb.mxu1 %v1245_v5  ;;  %568 = vmatpush.bf16.msrb.mxu3 %v1249_v8  ;;  %v1321_v57 = vor.u32 %v1525_v54, %v1318_v55  ;;  %v1543_v60 = vld [vmem:[#allocation10 + $0xf4] sm:$0xf]  ;;  %v1390_v62 = vld [vmem:[#allocation10 + $0xf8] sm:$0xf0]  ;;  %v1308_v0 = vld [vmem:[#allocation10 + $0x50] sm:$0xf] }
  0x49   :  { %v1393_v63 = vor.u32 %v1543_v60, %v1390_v62  ;;  %v1524_v1 = vld [vmem:[#allocation10 + $0x54] sm:$0xf0]  ;;  %v1523_v2 = vld [vmem:[#allocation10 + $0x54] sm:$0xf]  ;;  %v1310_v4 = vld [vmem:[#allocation10 + $0x58] sm:$0xf0] }
  0x4a   :  { %v1309_v3 = vor.u32 %v1524_v1, %v1308_v0  ;;  %v1380_v5 = vld [vmem:[#allocation10 + $0xe0] sm:$0xf]  ;;  %v1542_v6 = vld [vmem:[#allocation10 + $0xe4] sm:$0xf0]  ;;  %v1313_v7 = vor.u32 %v1523_v2, %v1310_v4  ;;  %v1541_v9 = vld [vmem:[#allocation10 + $0xe4] sm:$0xf] }
  0x4b   :  { %467 = vmatpush.bf16.msrb.mxu0 %v1183_v16  ;;  %454 = vmatpush.bf16.msrb.mxu2 %v1119_v21  ;;  %v1381_v8 = vor.u32 %v1542_v6, %v1380_v5  ;;  %v1382_v10 = vld [vmem:[#allocation10 + $0xe8] sm:$0xf0]  ;;  %v1300_v11 = vld [vmem:[#allocation10 + $0x40] sm:$0xf]  ;;  %v1522_v13 = vld [vmem:[#allocation10 + $0x44] sm:$0xf0] }
  0x4c   :  { %556 = vmatpush.bf16.msrb.mxu1 %v1237_v17  ;;  %569 = vmatpush.bf16.msrb.mxu3 %v1241_v18  ;;  %v1385_v12 = vor.u32 %v1541_v9, %v1382_v10  ;;  %v1521_v14 = vld [vmem:[#allocation10 + $0x44] sm:$0xf]  ;;  %v1302_v15 = vld [vmem:[#allocation10 + $0x48] sm:$0xf0]  ;;  %v1301_v16 = vor.u32 %v1522_v13, %v1300_v11  ;;  %v1372_v18 = vld [vmem:[#allocation10 + $0xd0] sm:$0xf] }
  0x4d   :  { %v1305_v17 = vor.u32 %v1521_v14, %v1302_v15  ;;  %v1540_v19 = vld [vmem:[#allocation10 + $0xd4] sm:$0xf0]  ;;  %v1539_v20 = vld [vmem:[#allocation10 + $0xd4] sm:$0xf]  ;;  %v1374_v22 = vld [vmem:[#allocation10 + $0xd8] sm:$0xf0] }
  0x4e   :  { %455 = vmatmul.bf16.vlgmr.msrb.gmra.mxu2 %v156_v61  ;;  %v1389_v61 = vor.u32 %v1544_v59, %v1388_v58  ;;  %v1373_v21 = vor.u32 %v1540_v19, %v1372_v18  ;;  %v1377_v23 = vor.u32 %v1539_v20, %v1374_v22  ;;  %v1519_v26 = vld [vmem:[#allocation10 + $0x34] sm:$0xf]  ;;  %v1294_v28 = vld [vmem:[#allocation10 + $0x38] sm:$0xf0]  ;;  %v1537_v32 = vld [vmem:[#allocation10 + $0xc4] sm:$0xf] }
  0x4f   :  { %789 = vmatpush.bf16.msra.mxu2 %v1325_v50  ;;  %v1297_v29 = vor.u32 %v1519_v26, %v1294_v28  ;;  %v1366_v34 = vld [vmem:[#allocation10 + $0xc8] sm:$0xf0]  ;;  %v1284_v35 = vld [vmem:[#allocation10 + $0x20] sm:$0xf]  ;;  %v1517_v39 = vld [vmem:[#allocation10 + $0x24] sm:$0xf] }
  0x50   :  { %557 = vmatpush.bf16.msrb.mxu1 %v1229_v24  ;;  %570 = vmatpush.bf16.msrb.mxu3 %v1233_v25  ;;  %v1292_v24 = vld [vmem:[#allocation10 + $0x30] sm:$0xf]  ;;  %v1520_v25 = vld [vmem:[#allocation10 + $0x34] sm:$0xf0]  ;;  %v1286_v40 = vld [vmem:[#allocation10 + $0x28] sm:$0xf0] }
  0x51   :  { %802 = vmatpush.bf16.msra.mxu0 %v1389_v61  ;;  %v1293_v27 = vor.u32 %v1520_v25, %v1292_v24  ;;  %v1289_v41 = vor.u32 %v1517_v39, %v1286_v40  ;;  %v1536_v44 = vld [vmem:[#allocation10 + $0xb4] sm:$0xf0]  ;;  %v1358_v47 = vld [vmem:[#allocation10 + $0xb8] sm:$0xf0]  ;;  %v1348_v54 = vld [vmem:[#allocation10 + $0xa0] sm:$0xf] }
  0x52   :  { %1201 = vmatmul.msk.bf16.vlgmr.msrb.gmra.mxu0 %vm384_vm1, %v1835_v43  ;;  %v1329_v43 = vor.u32 %v1527_v49, %v1326_v51  ;;  %v1276_v49 = vld [vmem:[#allocation10 + $0x10] sm:$0xf]  ;;  %v1516_v50 = vld [vmem:[#allocation10 + $0x14] sm:$0xf0]  ;;  %v1515_v51 = vld [vmem:[#allocation10 + $0x14] sm:$0xf] }
  0x53   :  { %790 = vmatpush.bf16.msra.mxu2 %v1317_v56  ;;  %v1277_v52 = vor.u32 %v1516_v50, %v1276_v49  ;;  %v1278_v53 = vld [vmem:[#allocation10 + $0x18] sm:$0xf0]  ;;  %v1534_v55 = vld [vmem:[#allocation10 + $0xa4] sm:$0xf0]  ;;  %v1350_v58 = vld [vmem:[#allocation10 + $0xa8] sm:$0xf0] }
  0x54   :  { %558 = vmatpush.bf16.msrb.mxu1 %v1221_v30  ;;  %571 = vmatpush.bf16.msrb.mxu3 %v1225_v31  ;;  %v1364_v30 = vld [vmem:[#allocation10 + $0xc0] sm:$0xf]  ;;  %v1538_v31 = vld [vmem:[#allocation10 + $0xc4] sm:$0xf0]  ;;  %v1349_v56 = vor.u32 %v1534_v55, %v1348_v54  ;;  %v1513_v62 = vld [vmem:[#allocation10 + $0x4] sm:$0xf] }
  0x55   :  { %803 = vmatpush.bf16.msra.mxu0 %v1381_v8  ;;  %v1365_v33 = vor.u32 %v1538_v31, %v1364_v30  ;;  %v1268_v60 = vld [vmem:[#allocation10] sm:$0xf]  ;;  %v1514_v61 = vld [vmem:[#allocation10 + $0x4] sm:$0xf0]  ;;  %v1270_v0 = vld [vmem:[#allocation10 + $0x8] sm:$0xf0] }
  0x56   :  { %v1273_v2 = vor.u32 %v1513_v62, %v1270_v0  ;;  %v1532_v4 = vld [vmem:[#allocation10 + $0x94] sm:$0xf0]  ;;  %v1531_v5 = vld [vmem:[#allocation10 + $0x94] sm:$0xf]  ;;  %v1342_v8 = vld [vmem:[#allocation10 + $0x98] sm:$0xf0] }
  0x57   :  { %791 = vmatpush.bf16.msra.mxu2 %v1309_v3  ;;  %v1340_v3 = vld [vmem:[#allocation10 + $0x90] sm:$0xf]  ;;  %v1345_v10 = vor.u32 %v1531_v5, %v1342_v8  ;;  %v1332_v11 = vld [vmem:[#allocation10 + $0x80] sm:$0xf]  ;;  %v1529_v13 = vld [vmem:[#allocation10 + $0x84] sm:$0xf] }
  0x58   :  { %559 = vmatpush.bf16.msrb.mxu1 %v1213_v36  ;;  %572 = vmatpush.bf16.msrb.mxu3 %v1217_v37  ;;  %v1518_v36 = vld [vmem:[#allocation10 + $0x24] sm:$0xf0]  ;;  %v1369_v37 = vor.u32 %v1537_v32, %v1366_v34  ;;  %v1560_v22 = vld [vmem:[#allocation11 + $0x78] sm:$0xff]  ;;  %v1559_v24 = vld [vmem:[#allocation11 + $0x70] sm:$0xff] }
  0x59   :  { %804 = vmatpush.bf16.msra.mxu0 %v1373_v21  ;;  %v1285_v38 = vor.u32 %v1518_v36, %v1284_v35  ;;  %v1552_v21 = vld [vmem:[#allocation11 + $0x38] sm:$0xff]  ;;  %v1550_v26 = vld [vmem:[#allocation11 + $0x28] sm:$0xff]  ;;  %v1549_v30 = vld [vmem:[#allocation11 + $0x20] sm:$0xff] }
  0x5a   :  { %v579_v32 = vld [vmem:[%s1858_s4] sm:$0x3]  ;;  %v1547_v54 = vld [vmem:[#allocation11 + $0x10] sm:$0xff] }
  0x5b   :  { %792 = vmatpush.bf16.msra.mxu2 %v1301_v16  ;;  %v1334_v16 = vld [vmem:[#allocation10 + $0x88] sm:$0xf0]  ;;  %v581_v34 = vperm.slane %v579_v32, 0  ;;  %v1556_v55 = vld [vmem:[#allocation11 + $0x58] sm:$0xff] }
  0x5c   :  { %560 = vmatpush.bf16.msrb.mxu1 %v1205_v42  ;;  %573 = vmatpush.bf16.msrb.mxu3 %v1209_v45  ;;  %v1356_v42 = vld [vmem:[#allocation10 + $0xb0] sm:$0xf]  ;;  %v1535_v45 = vld [vmem:[#allocation10 + $0xb4] sm:$0xf]  ;;  %v623_v62 = vld [vmem:[%s1860_s6] sm:$0x3] }
  0x5d   :  { %805 = vmatpush.bf16.msra.mxu0 %v1365_v33  ;;  %v1361_v48 = vor.u32 %v1535_v45, %v1358_v47 }
  0x5f   :  { %561 = vmatmul.bf16.vlgmr.msrb.gmra.mxu1 %v125_v46  ;;  %574 = vmatmul.bf16.vlgmr.msrb.gmra.mxu3 %v125_v46  ;;  %v1357_v46 = vor.u32 %v1536_v44, %v1356_v42  ;;  %v582_v44 = vperm.slane %v579_v32, 1 }
  0x60   :  { %815 = vmatpush.bf16.msra.mxu1 %v1329_v43  ;;  %828 = vmatpush.bf16.msra.mxu3 %v1393_v63  ;;  %v1281_v43 = vor.u32 %v1515_v51, %v1278_v53  ;;  %v1269_v63 = vor.u32 %v1514_v61, %v1268_v60  ;;  %v1548_v53 = vld [vmem:[#allocation11 + $0x18] sm:$0xff]  ;;  %v1553_v60 = vld [vmem:[#allocation11 + $0x40] sm:$0xff] }
  0x61   :  { %793 = vmatpush.bf16.msra.mxu2 %v1293_v27  ;;  %806 = vmatpush.bf16.msra.mxu0 %v1357_v46  ;;  %v1558_v27 = vld [vmem:[#allocation11 + $0x68] sm:$0xff] }
  0x64   :  { %816 = vmatpush.bf16.msra.mxu1 %v1321_v57  ;;  %829 = vmatpush.bf16.msra.mxu3 %v1385_v12  ;;  %v1533_v57 = vld [vmem:[#allocation10 + $0xa4] sm:$0xf]  ;;  %v1530_v12 = vld [vmem:[#allocation10 + $0x84] sm:$0xf0] }
  0x65   :  { %794 = vmatpush.bf16.msra.mxu2 %v1285_v38  ;;  %v1353_v59 = vor.u32 %v1533_v57, %v1350_v58  ;;  %807 = vmatpush.bf16.msra.mxu0 %v1349_v56  ;;  %v1333_v15 = vor.u32 %v1530_v12, %v1332_v11  ;;  %v1546_v56 = vld [vmem:[#allocation11 + $0x8] sm:$0xff]  ;;  %v1555_v57 = vld [vmem:[#allocation11 + $0x50] sm:$0xff]  ;;  %v1545_v58 = vld [vmem:[#allocation11] sm:$0xff] }
  0x68   :  { %817 = vmatpush.bf16.msra.mxu1 %v1313_v7  ;;  %830 = vmatpush.bf16.msra.mxu3 %v1377_v23  ;;  %v1341_v7 = vor.u32 %v1532_v4, %v1340_v3  ;;  %v1551_v23 = vld [vmem:[#allocation11 + $0x30] sm:$0xff]  ;;  %v626_v3 = vperm.slane %v623_v62, 1 }
  0x69   :  { %795 = vmatpush.bf16.msra.mxu2 %v1277_v52 }
  0x6a   :  { %808 = vmatpush.bf16.msra.mxu0 %v1341_v7 }
  0x6c   :  { %818 = vmatpush.bf16.msra.mxu1 %v1305_v17  ;;  %831 = vmatpush.bf16.msra.mxu3 %v1369_v37  ;;  %v1337_v17 = vor.u32 %v1529_v13, %v1334_v16  ;;  %v1572_v16 = vld [vmem:[%s1862_s8] ss:$0 sm:$0xff]  ;;  %s1765_s8 = smov [#allocation13]  }
  0x6d   :  { %796 = vmatpush.bf16.msra.mxu2 %v1269_v63  ;;  %v625_v63 = vperm.slane %v623_v62, 0  ;;  %s1033_s20 = sshll.u32 %s1765_s8, 4  ;;  %s1034_s20 = int_to_ptr.vmem [resolvable:$true] %s1033_s20 }
  0x6e   :  { %809 = vmatpush.bf16.msra.mxu0 %v1333_v15 }
  0x70   :  { %819 = vmatpush.bf16.msra.mxu1 %v1297_v29  ;;  %832 = vmatpush.bf16.msra.mxu3 %v1361_v48 }
  0x71   :  { %977 = vmatpush.bf16.msrb.mxu2 %v1552_v21 }
  0x72   :  { %990 = vmatpush.bf16.msrb.mxu0 %v1560_v22 }
  0x74   :  { %820 = vmatpush.bf16.msra.mxu1 %v1289_v41  ;;  %833 = vmatpush.bf16.msra.mxu3 %v1353_v59  ;;  %v1554_v59 = vld [vmem:[#allocation11 + $0x48] sm:$0xff] }
  0x75   :  { %978 = vmatpush.bf16.msrb.mxu2 %v1551_v23 }
  0x76   :  { %991 = vmatpush.bf16.msrb.mxu0 %v1559_v24 }
  0x78   :  { %821 = vmatpush.bf16.msra.mxu1 %v1281_v43  ;;  %834 = vmatpush.bf16.msra.mxu3 %v1345_v10  ;;  %v1557_v43 = vld [vmem:[#allocation11 + $0x60] sm:$0xff] }
  0x79   :  { %979 = vmatpush.bf16.msrb.mxu2 %v1550_v26 }
  0x7a   :  { %992 = vmatpush.bf16.msrb.mxu0 %v1558_v27  ;;  %v1003_v27 = vlaneseq }
  0x7c   :  { %822 = vmatpush.bf16.msra.mxu1 %v1273_v2  ;;  %835 = vmatpush.bf16.msra.mxu3 %v1337_v17 }
  0x7d   :  { %980 = vmatpush.bf16.msrb.mxu2 %v1549_v30  ;;  %v1004_v30 = vand.u32 127, %v1003_v27 }
  0x7e   :  { %993 = vmatpush.bf16.msrb.mxu0 %v1557_v43 }
  0x7f   :  { %vm1005_vm4 = vcmp.lt.s32.totalorder %v1004_v30, 34 }
  0x81   :  { %981 = vmatpush.bf16.msrb.mxu2 %v1548_v53 }
  0x82   :  { %994 = vmatpush.bf16.msrb.mxu0 %v1556_v55 }
  0x85   :  { %982 = vmatpush.bf16.msrb.mxu2 %v1547_v54 }
  0x86   :  { %995 = vmatpush.bf16.msrb.mxu0 %v1555_v57 }
  0x89   :  { %983 = vmatpush.bf16.msrb.mxu2 %v1546_v56 }
  0x8a   :  { %996 = vmatpush.bf16.msrb.mxu0 %v1554_v59 }
  0x8d   :  { %984 = vmatpush.bf16.msrb.mxu2 %v1545_v58 }
  0x8e   :  { %997 = vmatpush.bf16.msrb.mxu0 %v1553_v60 }
  0xbd   :  { %v430_v9 = vpop.f32.mrf.mxu2 }
  0xbe   :  { %v417_v1 = vpop.f32.mrf.mxu1 }
  0xbf   :  { %v404_v6 = vpop.f32.mrf.mxu0 }
  0xc0   :  { %v418_v31 = vadd.f32 %v417_v1, %v404_v6 }
  0xc2   :  { %v431_v33 = vadd.f32 %v430_v9, %v418_v31 }
  0xc4   :  { %v443_v14 = vpop.f32.mrf.mxu3 }
  0xc5   :  { %v432_v20 = vpop.f32.mrf.mxu2 }
  0xc6   :  { %v419_v18 = vpop.f32.mrf.mxu1 }
  0xc7   :  { %v406_v19 = vpop.f32.mrf.mxu0 }
  0xcc   :  { %v445_v25 = vpop.f32.mrf.mxu3 }
  0xcf   :  { %v469_v28 = vpop.f32.mrf.mxu0 }
  0xd1   :  { %v456_v29 = vpop.f32.mrf.mxu2 }
  0xd2   :  { %v457_v39 = vadd.f32 %v456_v29, %v443_v14 }
  0xd4   :  { %v470_v42 = vadd.f32 %v469_v28, %v457_v39 }
  0xd7   :  { %v471_v35 = vpop.f32.mrf.mxu0 }
  0xd9   :  { %v458_v37 = vpop.f32.mrf.mxu2 }
  0xdc   :  { %v562_v36 = vpop.f32.mrf.mxu1 }
  0xdd   :  { %v563_v38 = vadd.f32 %v562_v36, %v431_v33 }
  0xdf   :  { %v585_v40 = vadd.f32 %v581_v34, %v563_v38 }
  0xe1   :  { %v587_v41 = vmax.f32 %v585_v40, 0.0 }
  0xe2   :  { %v575_v46 = vpop.f32.mrf.mxu3 }
  0xe3   :  { %v589_v45 = vpack.c.bf16 %v587_v41, %v587_v41  ;;  %v576_v47 = vadd.f32 %v575_v46, %v470_v42 }
  0xe4   :  { %v564_v48 = vpop.f32.mrf.mxu1 }
  0xe5   :  { %797 = vmatmul.bf16.vlgmr.msra.gmra.mxu2 %v589_v45  ;;  %823 = vmatmul.bf16.vlgmr.msra.gmra.mxu1 %v589_v45  ;;  %v586_v49 = vadd.f32 %v582_v44, %v576_v47 }
  0xe7   :  { %v588_v50 = vmax.f32 %v586_v49, 0.0 }
  0xe9   :  { %v590_v51 = vpack.c.bf16 %v588_v50, %v588_v50 }
  0xea   :  { %v577_v52 = vpop.f32.mrf.mxu3 }
  0xeb   :  { %810 = vmatmul.bf16.vlgmr.msra.gmra.mxu0 %v590_v51  ;;  %836 = vmatmul.bf16.vlgmr.msra.gmra.mxu3 %v590_v51 }
 0x162   :  { %v824_v61 = vpop.f32.mrf.mxu1 }
 0x163   :  { %v825_v7 = vadd.f32 %v824_v61, %v626_v3 }
 0x168   :  { %v798_v0 = vpop.f32.mrf.mxu2  ;;  %v811_v2 = vpop.f32.mrf.mxu0 }
 0x169   :  { %v799_v1 = vadd.f32 %v798_v0, %v625_v63 }
 0x16a   :  { %v826_v4 = vpop.f32.mrf.mxu1 }
 0x16b   :  { %v812_v5 = vadd.f32 %v811_v2, %v799_v1 }
 0x16d   :  { %v841_v6 = vmax.f32 %v812_v5, 0.0 }
 0x16e   :  { %v837_v9 = vpop.f32.mrf.mxu3 }
 0x16f   :  { %v843_v8 = vpack.c.bf16 %v841_v6, %v841_v6  ;;  %v838_v10 = vadd.f32 %v837_v9, %v825_v7 }
 0x170   :  { %v800_v11 = vpop.f32.mrf.mxu2  ;;  %v813_v12 = vpop.f32.mrf.mxu0 }
 0x171   :  { %985 = vmatmul.bf16.vlgmr.msrb.gmra.mxu2 %v843_v8  ;;  %v842_v13 = vmax.f32 %v838_v10, 0.0 }
 0x173   :  { %v844_v14 = vpack.c.bf16 %v842_v13, %v842_v13 }
 0x175   :  { %998 = vmatmul.bf16.vlgmr.msrb.gmra.mxu0 %v844_v14 }
 0x176   :  { %v839_v15 = vpop.f32.mrf.mxu3 }
 0x1f2   :  { %v999_v17 = vpop.f32.mrf.mxu0 }
 0x1f4   :  { %v986_v18 = vpop.f32.mrf.mxu2 }
 0x1f5   :  { %v987_v19 = vadd.f32 %v1572_v16, %v986_v18 }
 0x1f7   :  { %v1000_v20 = vadd.f32 %v999_v17, %v987_v19 }
 0x1f9   :  { %v1458_v21 = vmul.f32 -1.442695, %v1000_v20  ;;  %v1006_v36 = vmul.f32 20.0, %v1000_v20 }
 0x1fa   :  { %v1001_v22 = vpop.f32.mrf.mxu0 }
 0x1fb   :  { %1573 = vpow2.f32 %v1458_v21 }
 0x1fc   :  { %v988_v23 = vpop.f32.mrf.mxu2 }
 0x201   :  { %v1574_v24 = vpop.eup %1573 }
 0x202   :  { %v1010_v25 = vadd.f32 1.0, %v1574_v24 }
 0x204   :  { %1575 = vrcp.f32 %v1010_v25  ;;  %v1022_v31 = vand.u32 2147483648, %v1010_v25  ;;  %v1020_v33 = vand.u32 2147483647, %v1010_v25  ;;  %vm1016_vm3 = vweird.f32 %v1010_v25 }
 0x206   :  { %v1023_v35 = vor.u32 1.1754944e-38, %v1022_v31  ;;  %vm1021_vm6 = vcmp.eq.f32.partialorder %v1020_v33, 8.507059e+37 }
 0x20a   :  { %v1576_v26 = vpop.eup %1575 }
 0x20b   :  { %v1012_v28 = vmul.f32 %v1576_v26, %v1010_v25  ;;  %vm1017_vm2 = vweird.f32 %v1576_v26 }
 0x20c   :  { %vm1018_vm5 = vmor %vm1016_vm3, %vm1017_vm2 }
 0x20d   :  { %v1013_v29 = vsub.f32 1.0, %v1012_v28 }
 0x20f   :  { %v1014_v32 = vmul.f32 %v1576_v26, %v1013_v29 }
 0x211   :  { %v1015_v34 = vadd.f32 %v1576_v26, %v1014_v32 }
 0x213   :  { %v1019_v37 = vsel %vm1018_vm5, %v1576_v26, %v1015_v34 }
 0x214   :  { %v1024_v38 = vsel %vm1021_vm6, %v1023_v35, %v1019_v37 }
 0x215   :  { %v1026_v39 = vsel %vm1005_vm4, %v1006_v36, %v1024_v38 }
 0x216   :  { %1027 = vst [vmem:[#allocation13] sm:$0xf] %v1026_v39 }
 0x217   :  { %1038 = dma.vmem_to_hbm [thread:$0]  %s1034_s20, 64, %s1036_s22, [#allocation4]  }
 0x218   :  { %1753 = dma.done.wait [#allocation4], 64  }
 0x219   :  { %1754 = vsyncadd [#allocation4], 4294967232 }
 0x21a   :  { %1043 = vsyncpa [#allocation3], 1 }
 0x21b   :  { %1044 = vsyncpa [#allocation6], 1 }
 0x21c   :  { %1045 = vsyncpa [#allocation9], 1 }
 0x21d   :  { %1046 = vsyncpa [#allocation12], 1 }
 0x21e   :  { %1047 = vsyncpa [#allocation4], 1 }

</bundles_post_ra>
